<compile_context>
chip_gen: v7x
topology: tpu7x:2x2x1
jax: 0.10.0
libtpu: 0.0.40
codegen_flags: <defaults>
</compile_context>

<pallas_src>
import functools
import math

import jax
import jax.numpy as jnp
import numpy as np
from jax.experimental import pallas as pl
from jax.experimental.pallas import tpu as pltpu


# --------------------------------------------------------------- shared math ---
def _softmax_top2(x):
    """Stable softmax + first-occurrence top-1 / top-2 over the expert axis.

    x: (TN, E) float32 logits.  Returns probs, top1, top2 (int32 (TN,1)),
    mask1, mask2 (bool (TN,E)), p1, p2 ((TN,1) top probs), lse ((TN,1)).
    """
    TN, E = x.shape
    m = jnp.max(x, axis=-1, keepdims=True)
    ex = jnp.exp(x - m)
    denom = jnp.sum(ex, axis=-1, keepdims=True)
    probs = ex / denom

    eidx = jax.lax.broadcasted_iota(jnp.int32, (TN, E), 1)
    p1 = jnp.max(probs, axis=-1, keepdims=True)
    top1 = jnp.min(jnp.where(probs >= p1, eidx, E), axis=-1, keepdims=True)
    mask1 = eidx == top1

    masked = jnp.where(mask1, -jnp.inf, probs)
    p2 = jnp.max(masked, axis=-1, keepdims=True)
    top2 = jnp.min(jnp.where(masked >= p2, eidx, E), axis=-1, keepdims=True)
    mask2 = eidx == top2

    lse = m + jnp.log(denom)
    return probs, top1, top2, mask1, mask2, p1, p2, lse


# ------------------------------------------------------------- pass 1 kernel ---
def _router_stats_kernel(x_ref, pref1_ref, pref2_ref, tot1_ref, aux_ref, z_ref,
                         cnt1_s, cnt2_s, accm_s, accp_s, z_s,
                         *, n_tokens, tile_tokens, needs_mask):
    t = pl.program_id(0)
    x = x_ref[...]                                  # (TN, E)
    TN, E = x.shape
    probs, _, _, mask1, mask2, _, _, lse = _softmax_top2(x)
    m1f = mask1.astype(jnp.float32)
    m2f = mask2.astype(jnp.float32)
    if needs_mask:
        tok = (t * tile_tokens
               + jax.lax.broadcasted_iota(jnp.int32, (TN, 1), 0))
        validf = (tok < n_tokens).astype(jnp.float32)
        m1f = m1f * validf
        m2f = m2f * validf
        probs = probs * validf
        lse = lse * validf

    @pl.when(t == 0)
    def _init():
        cnt1_s[...] = jnp.zeros_like(cnt1_s)
        cnt2_s[...] = jnp.zeros_like(cnt2_s)
        accm_s[...] = jnp.zeros_like(accm_s)
        accp_s[...] = jnp.zeros_like(accp_s)
        z_s[...] = jnp.zeros_like(z_s)

    # Exclusive prefix: tokens routed to each expert in *earlier* tiles.  The
    # (T,1,E) output block is resident (constant index map) -> one writeback.
    pref1_ref[t] = cnt1_s[...]
    pref2_ref[t] = cnt2_s[...]

    cnt1_s[...] += jnp.sum(m1f, axis=0, keepdims=True)
    cnt2_s[...] += jnp.sum(m2f, axis=0, keepdims=True)
    accm_s[...] += jnp.sum(jnp.maximum(m1f, m2f), axis=0, keepdims=True)
    accp_s[...] += jnp.sum(probs, axis=0, keepdims=True)
    z_s[...] += jnp.sum(lse * lse, axis=0, keepdims=True)

    @pl.when(t == pl.num_programs(0) - 1)
    def _finalize():
        n = jnp.float32(n_tokens)
        tot1_ref[...] = cnt1_s[...]
        # aux = E^2 * mean_e( mean_t(expert_mask) * mean_t(probs) )
        #     = E * sum_e( sum_t(expert_mask) * sum_t(probs) ) / N^2
        aux_ref[...] = (jnp.float32(E)
                        * jnp.sum(accm_s[...] * accp_s[...], axis=-1, keepdims=True)
                        / (n * n))
        z_ref[...] = z_s[...] / n


# ------------------------------------------------------------- pass 2 kernel ---
def _dispatch_kernel(x_ref, tri_ref, slot_ref, pref1_ref, pref2_ref, tot1_ref,
                     cb_ref, sec_ref, *, capacity, n_tokens, tile_tokens,
                     needs_mask):
    t = pl.program_id(0)
    x = x_ref[...]                                  # (TN, E)
    TN, E = x.shape
    C = capacity
    _, top1, top2, mask1, mask2, p1, p2, _ = _softmax_top2(x)
    m1f = mask1.astype(jnp.float32)
    m2f = mask2.astype(jnp.float32)

    if needs_mask:
        tok = (t * tile_tokens
               + jax.lax.broadcasted_iota(jnp.int32, (TN, 1), 0))
        valid = tok < n_tokens                      # (TN, 1) bool
    else:
        valid = None

    pref1 = pref1_ref[t]                            # (1, E) exclusive prefix
    pref2 = pref2_ref[t]
    tot1 = tot1_ref[...]                            # (1, E) total top-1 count

    # Tile-local inclusive cumsum along tokens: bf16 MXU matmul with the
    # grid-invariant lower triangle (resident input) and a fused (TN, 2E)
    # one-hot RHS (one matmul for both masks).  0/1 in bf16 with f32
    # accumulation keeps the ranks exact.
    e2 = jax.lax.broadcasted_iota(jnp.int32, (TN, 2 * E), 1)
    rhs = (e2 == top1) | (e2 == (top2 + E))
    if needs_mask:
        rhs = rhs & valid
    rhs = rhs.astype(jnp.float32).astype(jnp.bfloat16)
    csum = jnp.dot(tri_ref[...], rhs, preferred_element_type=jnp.float32)
    cum1 = csum[:, :E]
    cum2 = csum[:, E:]

    rank1 = cum1 - 1.0 + pref1                      # global rank of first choices
    rank2 = cum2 - 1.0 + pref2 + tot1               # seconds queue after all firsts
    r1 = jnp.sum(m1f * rank1, axis=-1, keepdims=True)   # (TN, 1) this token's slot
    r2 = jnp.sum(m2f * rank2, axis=-1, keepdims=True)

    cap = jnp.float32(C)
    keep1 = r1 < cap
    keep2 = r2 < cap
    if needs_mask:
        keep1 = keep1 & valid
        keep2 = keep2 & valid

    w1 = jnp.where(keep1, p1, 0.0)
    w2 = jnp.where(keep2, p2, 0.0)
    # Clamp dropped targets to -1 so they can never alias into another
    # expert's slot range (required for the fused select below).
    tgt1 = jnp.where(keep1, top1 * C + r1.astype(jnp.int32), -1)
    tgt2 = jnp.where(keep2, top2 * C + r2.astype(jnp.int32), -1)

    slot = slot_ref[...]                            # (TN, ECp) resident iota
    hit1 = slot == tgt1
    hit2 = slot == tgt2
    cb_ref[...] = jnp.where(hit1, w1, jnp.where(hit2, w2, 0.0))
    sec_ref[...] = (hit1 | hit2).astype(jnp.int8)


# ------------------------------------------------------------------- wrapper ---
def _get_capacity(n_tokens, n_experts, *, k_value=2,
                  capacity_factor=1.25, min_capacity=4):
    capacity = math.floor(k_value * capacity_factor * n_tokens / n_experts)
    capacity += capacity % 2
    capacity = max(capacity, min_capacity)
    assert capacity > 0
    return int(capacity)


def _vmem_limit_bytes():
    """Generation-aware scoped-VMEM budget (v5e/v6e: 128 MiB phys, v7x: 64 MiB)."""
    try:
        cap = int(pltpu.get_tpu_info().vmem_capacity_bytes)
    except Exception:
        cap = 64 * 1024 * 1024               # conservative (v7x-sized) fallback
    return max(32 * 1024 * 1024, min(3 * cap // 4, 96 * 1024 * 1024))


def _pick_token_tile(n_tokens, out_row_bytes, *, max_tile_bytes, max_tn=256):
    """Largest multiple-of-8 token tile whose f32 output tile fits the budget,
    capped at max_tn (cumsum matmul is O(TN^2); output DMA only O(TN))."""
    tn = (max_tile_bytes // max(out_row_bytes, 1)) // 8 * 8
    tn = max(8, min(int(tn), max_tn))
    n8 = ((n_tokens + 7) // 8) * 8
    return int(min(tn, n8))


def top2_router(inputs, *, token_tile=None, capacity_factor=1.25, min_capacity=4):
    """inputs: (tokens, num_experts) float32 router logits.

    Returns (cb_weight (N,E,C) f32, sec_mask (N,E,C) bool, aux_loss, z_loss).
    """
    assert inputs.dtype == jnp.float32
    N, E = inputs.shape
    assert N < (1 << 24), "rank arithmetic in f32 is exact only below 2^24 tokens"
    C = _get_capacity(N, E, capacity_factor=capacity_factor,
                      min_capacity=min_capacity)
    EC = E * C
    ECp = ((EC + 127) // 128) * 128          # lane-dense (multiple-of-128) width

    vmem_limit = _vmem_limit_bytes()
    if token_tile is None:
        # ~8 live f32-tile-equivalents in pass 2 (2x cb out, int8 out, slot
        # iota, select temporaries) -> keep the output tile at ~1/8 of budget.
        TN = _pick_token_tile(N, ECp * 4, max_tile_bytes=vmem_limit // 8)
    else:
        TN = int(token_tile)
        assert TN % 8 == 0, "token_tile must be a multiple of 8"
    Npad = ((N + TN - 1) // TN) * TN
    T = Npad // TN
    needs_mask = Npad != N
    x = jnp.pad(inputs, ((0, Npad - N), (0, 0))) if needs_mask else inputs

    # ---- pass 1: carried per-expert counts + aux / z losses --------------------
    p1_shapes = (
        jax.ShapeDtypeStruct((T, 1, E), jnp.float32),   # exclusive prefix of mask1
        jax.ShapeDtypeStruct((T, 1, E), jnp.float32),   # exclusive prefix of mask2
        jax.ShapeDtypeStruct((1, E), jnp.float32),      # total top-1 count / expert
        jax.ShapeDtypeStruct((1, 1), jnp.float32),      # aux loss
        jax.ShapeDtypeStruct((1, 1), jnp.float32),      # z loss
    )
    pref1, pref2, tot1, aux, z = pl.pallas_call(
        functools.partial(_router_stats_kernel, n_tokens=N, tile_tokens=TN,
                          needs_mask=needs_mask),
        out_shape=p1_shapes,
        grid=(T,),
        in_specs=[pl.BlockSpec((TN, E), lambda t: (t, 0))],
        out_specs=(
            pl.BlockSpec((T, 1, E), lambda t: (0, 0, 0)),   # resident, 1 writeback
            pl.BlockSpec((T, 1, E), lambda t: (0, 0, 0)),
            pl.BlockSpec((1, E), lambda t: (0, 0)),
            pl.BlockSpec((1, 1), lambda t: (0, 0)),
            pl.BlockSpec((1, 1), lambda t: (0, 0)),
        ),
        scratch_shapes=[
            pltpu.VMEM((1, E), jnp.float32),   # running top-1 counts
            pltpu.VMEM((1, E), jnp.float32),   # running top-2 counts
            pltpu.VMEM((1, E), jnp.float32),   # sum of expert_mask (aux)
            pltpu.VMEM((1, E), jnp.float32),   # sum of probs       (aux)
            pltpu.VMEM((1, 1), jnp.float32),   # sum of lse^2       (z)
        ],
        compiler_params=pltpu.CompilerParams(
            dimension_semantics=("arbitrary",),
            vmem_limit_bytes=vmem_limit,
        ),
    )(x)

    # ---- pass 2: ranks, capacity drop, lane-dense flattened dispatch scatter ---
    tri = jnp.asarray(np.tril(np.ones((TN, TN), np.float32)), dtype=jnp.bfloat16)
    slot = jnp.asarray(np.tile(np.arange(ECp, dtype=np.int32)[None, :], (TN, 1)))

    cb_flat, sec_flat = pl.pallas_call(
        functools.partial(_dispatch_kernel, capacity=C, n_tokens=N,
                          tile_tokens=TN, needs_mask=needs_mask),
        out_shape=(
            jax.ShapeDtypeStruct((Npad, ECp), jnp.float32),
            jax.ShapeDtypeStruct((Npad, ECp), jnp.int8),
        ),
        grid=(T,),
        in_specs=[
            pl.BlockSpec((TN, E), lambda t: (t, 0)),       # logits tile
            pl.BlockSpec((TN, TN), lambda t: (0, 0)),      # triangle (resident)
            pl.BlockSpec((TN, ECp), lambda t: (0, 0)),     # slot iota (resident)
            pl.BlockSpec((T, 1, E), lambda t: (0, 0, 0)),  # pref1 (resident)
            pl.BlockSpec((T, 1, E), lambda t: (0, 0, 0)),  # pref2 (resident)
            pl.BlockSpec((1, E), lambda t: (0, 0)),        # tot1  (resident)
        ],
        out_specs=(
            pl.BlockSpec((TN, ECp), lambda t: (t, 0)),     # combine weights f32
            pl.BlockSpec((TN, ECp), lambda t: (t, 0)),     # dispatch mask int8
        ),
        compiler_params=pltpu.CompilerParams(
            # TODO(synk): evaluate pltpu.CORE_PARALLEL on this axis for v7x.
            dimension_semantics=("parallel",),
            vmem_limit_bytes=vmem_limit,
        ),
    )(x, tri, slot, pref1, pref2, tot1)

    cb = cb_flat[:N, :EC].reshape(N, E, C)
    sec_mask = sec_flat[:N, :EC].reshape(N, E, C).astype(bool)
    return cb, sec_mask, aux[0, 0], z[0, 0]


# --------------------------------------------------------- pure-JAX reference ---
def _reference(x, capacity):
    N, E = x.shape
    probs = jax.nn.softmax(x, axis=-1)
    top1 = jnp.argmax(probs, axis=-1)
    mask1 = jax.nn.one_hot(top1, E, dtype=jnp.int32)
    masked = jnp.where(mask1.astype(bool), -jnp.inf, probs)
    top2 = jnp.argmax(masked, axis=-1)
    mask2 = jax.nn.one_hot(top2, E, dtype=jnp.int32)

    expert_mask = jnp.maximum(mask1, mask2).astype(jnp.float32)
    aux = (E ** 2) * jnp.mean(jnp.mean(expert_mask, axis=0) * jnp.mean(probs, axis=0))
    lse = jax.scipy.special.logsumexp(x, axis=-1)
    z = jnp.sum(lse ** 2) / N

    rank1 = jnp.cumsum(mask1, axis=0) - 1
    rank2 = jnp.cumsum(mask2, axis=0) - 1 + jnp.sum(mask1, axis=0, keepdims=True)
    mask1 = mask1 * (rank1 < capacity)
    mask2 = mask2 * (rank2 < capacity)
    r1 = jnp.sum(mask1 * rank1, axis=-1)
    r2 = jnp.sum(mask2 * rank2, axis=-1)
    w1 = mask1 * probs
    w2 = mask2 * probs

    idx = jnp.arange(N)
    cb = jnp.zeros((N, E, capacity), jnp.float32)
    cb = cb.at[idx, top1, r1].add(w1[idx, top1])
    cb = cb.at[idx, top2, r2].add(w2[idx, top2])
    sm = jnp.zeros((N, E, capacity), jnp.int32)
    sm = sm.at[idx, top1, r1].add(mask1[idx, top1])
    sm = sm.at[idx, top2, r2].add(mask2[idx, top2])
    return cb, sm > 0, aux, z


# ------------------------------------------------------------------------ main ---
if __name__ == "__main__":
    def _check(n_tokens, n_experts, token_tile, key):
        x = jax.random.normal(key, (n_tokens, n_experts), dtype=jnp.float32)
        cb, sm, aux, z = top2_router(x, token_tile=token_tile)
        jax.block_until_ready((cb, sm, aux, z))
        cap = _get_capacity(n_tokens, n_experts)
        cb_ref, sm_ref, aux_ref, z_ref = _reference(x, cap)
        np.testing.assert_allclose(np.asarray(cb), np.asarray(cb_ref),
                                   rtol=1e-5, atol=1e-5)
        np.testing.assert_array_equal(np.asarray(sm), np.asarray(sm_ref))
        np.testing.assert_allclose(float(aux), float(aux_ref), rtol=1e-5, atol=1e-5)
        np.testing.assert_allclose(float(z), float(z_ref), rtol=1e-5, atol=1e-5)

    key = jax.random.PRNGKey(0)
    k1, k2 = jax.random.split(key)
    # tokens = batch_size * seq_len = 2 * 8 = 16, num_experts = 8.
    # token_tile=8 -> 2 tiles: exercises the carried-prefix / cumsum path.
    _check(16, 8, 8, k1)
    # tokens not a multiple of the tile -> exercises the padded / masked path.
    _check(20, 8, 8, k2)

    print("KERNEL_OK")
</pallas_src>

<mosaic_0001>
module attributes {stable_mosaic.version = 11 : i64} {
  func.func @_router_stats_kernel(%arg0: i32, %arg1: memref<8x8xf32, #tpu.memory_space<vmem>>, %arg2: memref<2x1x8xf32, #tpu.memory_space<vmem>>, %arg3: memref<2x1x8xf32, #tpu.memory_space<vmem>>, %arg4: memref<1x8xf32, #tpu.memory_space<vmem>>, %arg5: memref<1x1xf32, #tpu.memory_space<vmem>>, %arg6: memref<1x1xf32, #tpu.memory_space<vmem>>, %arg7: memref<1x8xf32, #tpu.memory_space<vmem>>, %arg8: memref<1x8xf32, #tpu.memory_space<vmem>>, %arg9: memref<1x8xf32, #tpu.memory_space<vmem>>, %arg10: memref<1x8xf32, #tpu.memory_space<vmem>>, %arg11: memref<1x1xf32, #tpu.memory_space<vmem>>) attributes {dimension_semantics = [#tpu.dimension_semantics<arbitrary>], iteration_bounds = array<i64: 2>, scalar_prefetch = 0 : i64, scratch_operands = 5 : i64, tpu.core_type = #tpu.core_type<tc>, window_params = [{transform_indices = @transform_0, window_bounds = array<i64: 8, 8>}, {pipeline_mode = #tpu.pipeline_mode<synchronous>, transform_indices = @transform_1, window_bounds = array<i64: 2, 1, 8>}, {pipeline_mode = #tpu.pipeline_mode<synchronous>, transform_indices = @transform_2, window_bounds = array<i64: 2, 1, 8>}, {pipeline_mode = #tpu.pipeline_mode<synchronous>, transform_indices = @transform_3, window_bounds = array<i64: 1, 8>}, {pipeline_mode = #tpu.pipeline_mode<synchronous>, transform_indices = @transform_4, window_bounds = array<i64: 1, 1>}, {pipeline_mode = #tpu.pipeline_mode<synchronous>, transform_indices = @transform_5, window_bounds = array<i64: 1, 1>}]} {
    %c0 = arith.constant 0 : index
    %c0_0 = arith.constant 0 : index
    %0 = vector.load %arg1[%c0, %c0_0] : memref<8x8xf32, #tpu.memory_space<vmem>>, vector<8x8xf32>
    %cst = arith.constant dense<0xFF800000> : vector<8xf32>
    %1 = vector.multi_reduction <maximumf>, %0, %cst [1] : vector<8x8xf32> to vector<8xf32>
    %2 = vector.shape_cast %1 : vector<8xf32> to vector<8x1xf32>
    %3 = vector.broadcast %2 : vector<8x1xf32> to vector<8x8xf32>
    %4 = arith.subf %0, %3 : vector<8x8xf32>
    %5 = math.exp %4 : vector<8x8xf32>
    %cst_1 = arith.constant dense<0.000000e+00> : vector<8xf32>
    %6 = vector.multi_reduction <add>, %5, %cst_1 [1] : vector<8x8xf32> to vector<8xf32>
    %7 = vector.shape_cast %6 : vector<8xf32> to vector<8x1xf32>
    %8 = vector.broadcast %7 : vector<8x1xf32> to vector<8x8xf32>
    %9 = arith.divf %5, %8 : vector<8x8xf32>
    %10 = tpu.iota {dimensions = array<i32: 1>} : vector<8x8xi32>
    %cst_2 = arith.constant dense<0xFF800000> : vector<8xf32>
    %11 = vector.multi_reduction <maximumf>, %9, %cst_2 [1] : vector<8x8xf32> to vector<8xf32>
    %12 = vector.shape_cast %11 : vector<8xf32> to vector<8x1xf32>
    %13 = vector.broadcast %12 : vector<8x1xf32> to vector<8x8xf32>
    %14 = arith.cmpf oge, %9, %13 : vector<8x8xf32>
    %c8_i32 = arith.constant 8 : i32
    %15 = vector.broadcast %c8_i32 : i32 to vector<8x8xi32>
    %16 = arith.select %14, %10, %15 : vector<8x8xi1>, vector<8x8xi32>
    %cst_3 = arith.constant dense<2147483647> : vector<8xi32>
    %17 = vector.multi_reduction <minsi>, %16, %cst_3 [1] : vector<8x8xi32> to vector<8xi32>
    %18 = vector.shape_cast %17 : vector<8xi32> to vector<8x1xi32>
    %19 = vector.broadcast %18 : vector<8x1xi32> to vector<8x8xi32>
    %20 = arith.cmpi eq, %10, %19 : vector<8x8xi32>
    %cst_4 = arith.constant 0xFF800000 : f32
    %21 = vector.broadcast %cst_4 : f32 to vector<8x8xf32>
    %22 = arith.select %20, %21, %9 : vector<8x8xi1>, vector<8x8xf32>
    %cst_5 = arith.constant dense<0xFF800000> : vector<8xf32>
    %23 = vector.multi_reduction <maximumf>, %22, %cst_5 [1] : vector<8x8xf32> to vector<8xf32>
    %24 = vector.shape_cast %23 : vector<8xf32> to vector<8x1xf32>
    %25 = vector.broadcast %24 : vector<8x1xf32> to vector<8x8xf32>
    %26 = arith.cmpf oge, %22, %25 : vector<8x8xf32>
    %c8_i32_6 = arith.constant 8 : i32
    %27 = vector.broadcast %c8_i32_6 : i32 to vector<8x8xi32>
    %28 = arith.select %26, %10, %27 : vector<8x8xi1>, vector<8x8xi32>
    %cst_7 = arith.constant dense<2147483647> : vector<8xi32>
    %29 = vector.multi_reduction <minsi>, %28, %cst_7 [1] : vector<8x8xi32> to vector<8xi32>
    %30 = vector.shape_cast %29 : vector<8xi32> to vector<8x1xi32>
    %31 = vector.broadcast %30 : vector<8x1xi32> to vector<8x8xi32>
    %32 = arith.cmpi eq, %10, %31 : vector<8x8xi32>
    %33 = math.log %7 : vector<8x1xf32>
    %34 = arith.addf %2, %33 : vector<8x1xf32>
    %35 = arith.extui %20 : vector<8x8xi1> to vector<8x8xi32>
    %36 = arith.sitofp %35 : vector<8x8xi32> to vector<8x8xf32>
    %37 = arith.extui %32 : vector<8x8xi1> to vector<8x8xi32>
    %38 = arith.sitofp %37 : vector<8x8xi32> to vector<8x8xf32>
    %c0_i32 = arith.constant 0 : i32
    %39 = arith.cmpi eq, %arg0, %c0_i32 : i32
    %40 = arith.extui %39 : i1 to i32
    %c0_i32_8 = arith.constant 0 : i32
    %41 = arith.cmpi ne, %40, %c0_i32_8 : i32
    scf.if %41 {
      %cst_43 = arith.constant 0.000000e+00 : f32
      %82 = vector.broadcast %cst_43 : f32 to vector<1x8xf32>
      %c0_44 = arith.constant 0 : index
      %c0_45 = arith.constant 0 : index
      %83 = vector.load %arg7[%c0_44, %c0_45] : memref<1x8xf32, #tpu.memory_space<vmem>>, vector<1x8xf32>
      tpu.vector_store %arg7[%c0_44, %c0_45], %82 {strides = array<i32>} : memref<1x8xf32, #tpu.memory_space<vmem>>, vector<1x8xf32>,
      %cst_46 = arith.constant 0.000000e+00 : f32
      %84 = vector.broadcast %cst_46 : f32 to vector<1x8xf32>
      %c0_47 = arith.constant 0 : index
      %c0_48 = arith.constant 0 : index
      %85 = vector.load %arg8[%c0_47, %c0_48] : memref<1x8xf32, #tpu.memory_space<vmem>>, vector<1x8xf32>
      tpu.vector_store %arg8[%c0_47, %c0_48], %84 {strides = array<i32>} : memref<1x8xf32, #tpu.memory_space<vmem>>, vector<1x8xf32>,
      %cst_49 = arith.constant 0.000000e+00 : f32
      %86 = vector.broadcast %cst_49 : f32 to vector<1x8xf32>
      %c0_50 = arith.constant 0 : index
      %c0_51 = arith.constant 0 : index
      %87 = vector.load %arg9[%c0_50, %c0_51] : memref<1x8xf32, #tpu.memory_space<vmem>>, vector<1x8xf32>
      tpu.vector_store %arg9[%c0_50, %c0_51], %86 {strides = array<i32>} : memref<1x8xf32, #tpu.memory_space<vmem>>, vector<1x8xf32>,
      %cst_52 = arith.constant 0.000000e+00 : f32
      %88 = vector.broadcast %cst_52 : f32 to vector<1x8xf32>
      %c0_53 = arith.constant 0 : index
      %c0_54 = arith.constant 0 : index
      %89 = vector.load %arg10[%c0_53, %c0_54] : memref<1x8xf32, #tpu.memory_space<vmem>>, vector<1x8xf32>
      tpu.vector_store %arg10[%c0_53, %c0_54], %88 {strides = array<i32>} : memref<1x8xf32, #tpu.memory_space<vmem>>, vector<1x8xf32>,
      %cst_55 = arith.constant 0.000000e+00 : f32
      %90 = vector.broadcast %cst_55 : f32 to vector<1x1xf32>
      %c0_56 = arith.constant 0 : index
      %c0_57 = arith.constant 0 : index
      %91 = vector.load %arg11[%c0_56, %c0_57] : memref<1x1xf32, #tpu.memory_space<vmem>>, vector<1x1xf32>
      tpu.vector_store %arg11[%c0_56, %c0_57], %90 {strides = array<i32>} : memref<1x1xf32, #tpu.memory_space<vmem>>, vector<1x1xf32>,
    } else {
    }
    %c0_9 = arith.constant 0 : index
    %c0_10 = arith.constant 0 : index
    %42 = vector.load %arg7[%c0_9, %c0_10] : memref<1x8xf32, #tpu.memory_space<vmem>>, vector<1x8xf32>
    %43 = arith.index_cast %arg0 : i32 to index
    %c0_11 = arith.constant 0 : index
    %c0_12 = arith.constant 0 : index
    %44 = vector.load %arg2[%43, %c0_11, %c0_12] : memref<2x1x8xf32, #tpu.memory_space<vmem>>, vector<1x1x8xf32>
    %45 = vector.shape_cast %44 : vector<1x1x8xf32> to vector<1x8xf32>
    %46 = vector.shape_cast %42 : vector<1x8xf32> to vector<1x1x8xf32>
    tpu.vector_store %arg2[%43, %c0_11, %c0_12], %46 {strides = array<i32>} : memref<2x1x8xf32, #tpu.memory_space<vmem>>, vector<1x1x8xf32>,
    %c0_13 = arith.constant 0 : index
    %c0_14 = arith.constant 0 : index
    %47 = vector.load %arg8[%c0_13, %c0_14] : memref<1x8xf32, #tpu.memory_space<vmem>>, vector<1x8xf32>
    %48 = arith.index_cast %arg0 : i32 to index
    %c0_15 = arith.constant 0 : index
    %c0_16 = arith.constant 0 : index
    %49 = vector.load %arg3[%48, %c0_15, %c0_16] : memref<2x1x8xf32, #tpu.memory_space<vmem>>, vector<1x1x8xf32>
    %50 = vector.shape_cast %49 : vector<1x1x8xf32> to vector<1x8xf32>
    %51 = vector.shape_cast %47 : vector<1x8xf32> to vector<1x1x8xf32>
    tpu.vector_store %arg3[%48, %c0_15, %c0_16], %51 {strides = array<i32>} : memref<2x1x8xf32, #tpu.memory_space<vmem>>, vector<1x1x8xf32>,
    %c0_17 = arith.constant 0 : index
    %c0_18 = arith.constant 0 : index
    %52 = vector.load %arg7[%c0_17, %c0_18] : memref<1x8xf32, #tpu.memory_space<vmem>>, vector<1x8xf32>
    %cst_19 = arith.constant dense<0.000000e+00> : vector<8xf32>
    %53 = vector.multi_reduction <add>, %36, %cst_19 [0] : vector<8x8xf32> to vector<8xf32>
    %54 = vector.shape_cast %53 : vector<8xf32> to vector<1x8xf32>
    %55 = arith.addf %52, %54 : vector<1x8xf32>
    %c0_20 = arith.constant 0 : index
    %c0_21 = arith.constant 0 : index
    %56 = vector.load %arg7[%c0_20, %c0_21] : memref<1x8xf32, #tpu.memory_space<vmem>>, vector<1x8xf32>
    tpu.vector_store %arg7[%c0_20, %c0_21], %55 {strides = array<i32>} : memref<1x8xf32, #tpu.memory_space<vmem>>, vector<1x8xf32>,
    %c0_22 = arith.constant 0 : index
    %c0_23 = arith.constant 0 : index
    %57 = vector.load %arg8[%c0_22, %c0_23] : memref<1x8xf32, #tpu.memory_space<vmem>>, vector<1x8xf32>
    %cst_24 = arith.constant dense<0.000000e+00> : vector<8xf32>
    %58 = vector.multi_reduction <add>, %38, %cst_24 [0] : vector<8x8xf32> to vector<8xf32>
    %59 = vector.shape_cast %58 : vector<8xf32> to vector<1x8xf32>
    %60 = arith.addf %57, %59 : vector<1x8xf32>
    %c0_25 = arith.constant 0 : index
    %c0_26 = arith.constant 0 : index
    %61 = vector.load %arg8[%c0_25, %c0_26] : memref<1x8xf32, #tpu.memory_space<vmem>>, vector<1x8xf32>
    tpu.vector_store %arg8[%c0_25, %c0_26], %60 {strides = array<i32>} : memref<1x8xf32, #tpu.memory_space<vmem>>, vector<1x8xf32>,
    %c0_27 = arith.constant 0 : index
    %c0_28 = arith.constant 0 : index
    %62 = vector.load %arg9[%c0_27, %c0_28] : memref<1x8xf32, #tpu.memory_space<vmem>>, vector<1x8xf32>
    %63 = arith.maximumf %36, %38 : vector<8x8xf32>
    %cst_29 = arith.constant dense<0.000000e+00> : vector<8xf32>
    %64 = vector.multi_reduction <add>, %63, %cst_29 [0] : vector<8x8xf32> to vector<8xf32>
    %65 = vector.shape_cast %64 : vector<8xf32> to vector<1x8xf32>
    %66 = arith.addf %62, %65 : vector<1x8xf32>
    %c0_30 = arith.constant 0 : index
    %c0_31 = arith.constant 0 : index
    %67 = vector.load %arg9[%c0_30, %c0_31] : memref<1x8xf32, #tpu.memory_space<vmem>>, vector<1x8xf32>
    tpu.vector_store %arg9[%c0_30, %c0_31], %66 {strides = array<i32>} : memref<1x8xf32, #tpu.memory_space<vmem>>, vector<1x8xf32>,
    %c0_32 = arith.constant 0 : index
    %c0_33 = arith.constant 0 : index
    %68 = vector.load %arg10[%c0_32, %c0_33] : memref<1x8xf32, #tpu.memory_space<vmem>>, vector<1x8xf32>
    %cst_34 = arith.constant dense<0.000000e+00> : vector<8xf32>
    %69 = vector.multi_reduction <add>, %9, %cst_34 [0] : vector<8x8xf32> to vector<8xf32>
    %70 = vector.shape_cast %69 : vector<8xf32> to vector<1x8xf32>
    %71 = arith.addf %68, %70 : vector<1x8xf32>
    %c0_35 = arith.constant 0 : index
    %c0_36 = arith.constant 0 : index
    %72 = vector.load %arg10[%c0_35, %c0_36] : memref<1x8xf32, #tpu.memory_space<vmem>>, vector<1x8xf32>
    tpu.vector_store %arg10[%c0_35, %c0_36], %71 {strides = array<i32>} : memref<1x8xf32, #tpu.memory_space<vmem>>, vector<1x8xf32>,
    %c0_37 = arith.constant 0 : index
    %c0_38 = arith.constant 0 : index
    %73 = vector.load %arg11[%c0_37, %c0_38] : memref<1x1xf32, #tpu.memory_space<vmem>>, vector<1x1xf32>
    %74 = arith.mulf %34, %34 : vector<8x1xf32>
    %cst_39 = arith.constant dense<0.000000e+00> : vector<1xf32>
    %75 = vector.multi_reduction <add>, %74, %cst_39 [0] : vector<8x1xf32> to vector<1xf32>
    %76 = vector.shape_cast %75 : vector<1xf32> to vector<1x1xf32>
    %77 = arith.addf %73, %76 : vector<1x1xf32>
    %c0_40 = arith.constant 0 : index
    %c0_41 = arith.constant 0 : index
    %78 = vector.load %arg11[%c0_40, %c0_41] : memref<1x1xf32, #tpu.memory_space<vmem>>, vector<1x1xf32>
    tpu.vector_store %arg11[%c0_40, %c0_41], %77 {strides = array<i32>} : memref<1x1xf32, #tpu.memory_space<vmem>>, vector<1x1xf32>,
    %c1_i32 = arith.constant 1 : i32
    %79 = arith.cmpi eq, %arg0, %c1_i32 : i32
    %80 = arith.extui %79 : i1 to i32
    %c0_i32_42 = arith.constant 0 : i32
    %81 = arith.cmpi ne, %80, %c0_i32_42 : i32
    scf.if %81 {
      %c0_43 = arith.constant 0 : index
      %c0_44 = arith.constant 0 : index
      %82 = vector.load %arg7[%c0_43, %c0_44] : memref<1x8xf32, #tpu.memory_space<vmem>>, vector<1x8xf32>
      %c0_45 = arith.constant 0 : index
      %c0_46 = arith.constant 0 : index
      %83 = vector.load %arg4[%c0_45, %c0_46] : memref<1x8xf32, #tpu.memory_space<vmem>>, vector<1x8xf32>
      tpu.vector_store %arg4[%c0_45, %c0_46], %82 {strides = array<i32>} : memref<1x8xf32, #tpu.memory_space<vmem>>, vector<1x8xf32>,
      %c0_47 = arith.constant 0 : index
      %c0_48 = arith.constant 0 : index
      %84 = vector.load %arg9[%c0_47, %c0_48] : memref<1x8xf32, #tpu.memory_space<vmem>>, vector<1x8xf32>
      %c0_49 = arith.constant 0 : index
      %c0_50 = arith.constant 0 : index
      %85 = vector.load %arg10[%c0_49, %c0_50] : memref<1x8xf32, #tpu.memory_space<vmem>>, vector<1x8xf32>
      %86 = arith.mulf %84, %85 : vector<1x8xf32>
      %cst_51 = arith.constant dense<0.000000e+00> : vector<1xf32>
      %87 = vector.multi_reduction <add>, %86, %cst_51 [1] : vector<1x8xf32> to vector<1xf32>
      %88 = vector.shape_cast %87 : vector<1xf32> to vector<1x1xf32>
      %cst_52 = arith.constant 8.000000e+00 : f32
      %89 = vector.broadcast %cst_52 : f32 to vector<1x1xf32>
      %90 = arith.mulf %89, %88 : vector<1x1xf32>
      %cst_53 = arith.constant 1.600000e+01 : f32
      %cst_54 = arith.constant 1.600000e+01 : f32
      %91 = arith.mulf %cst_53, %cst_54 : f32
      %92 = vector.broadcast %91 : f32 to vector<1x1xf32>
      %93 = arith.divf %90, %92 : vector<1x1xf32>
      %c0_55 = arith.constant 0 : index
      %c0_56 = arith.constant 0 : index
      %94 = vector.load %arg5[%c0_55, %c0_56] : memref<1x1xf32, #tpu.memory_space<vmem>>, vector<1x1xf32>
      tpu.vector_store %arg5[%c0_55, %c0_56], %93 {strides = array<i32>} : memref<1x1xf32, #tpu.memory_space<vmem>>, vector<1x1xf32>,
      %c0_57 = arith.constant 0 : index
      %c0_58 = arith.constant 0 : index
      %95 = vector.load %arg11[%c0_57, %c0_58] : memref<1x1xf32, #tpu.memory_space<vmem>>, vector<1x1xf32>
      %cst_59 = arith.constant 1.600000e+01 : f32
      %96 = vector.broadcast %cst_59 : f32 to vector<1x1xf32>
      %97 = arith.divf %95, %96 : vector<1x1xf32>
      %c0_60 = arith.constant 0 : index
      %c0_61 = arith.constant 0 : index
      %98 = vector.load %arg6[%c0_60, %c0_61] : memref<1x1xf32, #tpu.memory_space<vmem>>, vector<1x1xf32>
      tpu.vector_store %arg6[%c0_60, %c0_61], %97 {strides = array<i32>} : memref<1x1xf32, #tpu.memory_space<vmem>>, vector<1x1xf32>,
    } else {
    }
    return
  }
  func.func @transform_0(%arg0: i32) -> (i32, i32) {
    %c0_i32 = arith.constant 0 : i32
    %c0_i32_0 = arith.constant 0 : i32
    return %arg0, %c0_i32 : i32, i32
  }
  func.func @transform_1(%arg0: i32) -> (i32, i32, i32) {
    %c0_i32 = arith.constant 0 : i32
    %c0_i32_0 = arith.constant 0 : i32
    %c0_i32_1 = arith.constant 0 : i32
    %c0_i32_2 = arith.constant 0 : i32
    return %c0_i32, %c0_i32_0, %c0_i32_1 : i32, i32, i32
  }
  func.func @transform_2(%arg0: i32) -> (i32, i32, i32) {
    %c0_i32 = arith.constant 0 : i32
    %c0_i32_0 = arith.constant 0 : i32
    %c0_i32_1 = arith.constant 0 : i32
    %c0_i32_2 = arith.constant 0 : i32
    return %c0_i32, %c0_i32_0, %c0_i32_1 : i32, i32, i32
  }
  func.func @transform_3(%arg0: i32) -> (i32, i32) {
    %c0_i32 = arith.constant 0 : i32
    %c0_i32_0 = arith.constant 0 : i32
    %c0_i32_1 = arith.constant 0 : i32
    return %c0_i32, %c0_i32_0 : i32, i32
  }
  func.func @transform_4(%arg0: i32) -> (i32, i32) {
    %c0_i32 = arith.constant 0 : i32
    %c0_i32_0 = arith.constant 0 : i32
    %c0_i32_1 = arith.constant 0 : i32
    return %c0_i32, %c0_i32_0 : i32, i32
  }
  func.func @transform_5(%arg0: i32) -> (i32, i32) {
    %c0_i32 = arith.constant 0 : i32
    %c0_i32_0 = arith.constant 0 : i32
    %c0_i32_1 = arith.constant 0 : i32
    return %c0_i32, %c0_i32_0 : i32, i32
  }
}

</mosaic_0001>

<bundles_post_ra>
// kernel: tpu_custom_call.1
= control target key start
LH: loop header
LB: loop body
LE: loop exit
PB: predicated region body
PF: predicated region fallthrough
CT: control target
= control target key end

     0   :  { %11 = vsyncpa [#allocation8], 0  ;;  %s925_s0 = inlined_call_operand.vmem [shape: f32[16,8], index: 0, kind: input, shape index: {}]   ;;  %s926_s1 = inlined_call_operand.hbm [shape: f32[2,1,8], index: 1, kind: output, shape index: {0}]   ;;  %s927_s2 = inlined_call_operand.hbm [shape: f32[2,1,8], index: 2, kind: output, shape index: {1}]   ;;  %s928_s3 = inlined_call_operand.hbm [shape: f32[1,8], index: 3, kind: output, shape index: {2}]   ;;  %s929_s4 = inlined_call_operand.hbm [shape: f32[1,1], index: 4, kind: output, shape index: {3}]   ;;  %s930_s5 = inlined_call_operand.hbm [shape: f32[1,1], index: 5, kind: output, shape index: {4}]  }
   0x1   :  { %12 = vsyncpa [#allocation10], 0 }
   0x2   :  { %13 = vsyncpa [#allocation13], 0  ;;  %s763_s18 = smov 0  }
   0x3 LB: > { %s769_s19 = sadd.s32 4294967295, %s722_s18   ;;  %p495_p0 = scmp.ge.s32.totalorder %s722_s18, 1  ;;  %s722_s18 = sphi %s763_s18, %s19_s18  }
   0x4   : > { %p173_p1 = scmp.lt.s32.totalorder %s722_s18, 3 }
   0x6   : > { %p174_p2 = pnand %p495_p0, %p173_p1 }
   0x7   : > { %p195_p3 = scmp.lt.s32.totalorder (!%p174_p2), %s769_s19, 1  ;;  %vm200_vm0 = vcmask (!%p174_p2), 64512   ;;  %v212_v14 = vlaneseq (!%p174_p2)  ;;  %v724_v31 = vmov (!%p174_p2), 0.0   ;;  %p499_p4 = scmp.ne.s32.totalorder (!%p174_p2), %s769_s19, 0 }
   0x8   : > { %177 = sbr.rel (%p174_p2) target bundleno = 1511 (0x5e7), region = 24 }
   0x9   : > { %v213_v15 = vand.u32 (!%p174_p2), 127, %v212_v14 }
   0xf   : > { %s196_s20 = scalar_select %p195_p3, %s769_s19, 1 }
  0x10   : > { %vm268_vm7 = vcmask (!%p499_p4), 57344   ;;  %vm273_vm8 = vcmask (!%p499_p4), 0   ;;  %v725_v49 = vmov (!%p499_p4), 0.0  }
  0x11   : > { %s496_s21 = sshll.u32 %s196_s20, 3  ;;  %269 = vst.msk [vmem:[#allocation2] sm:$0x1] (!%p499_p4), %vm268_vm7, %v725_v49  ;;  %270 = vst.msk [vmem:[#allocation3] sm:$0x1] (!%p499_p4), %vm268_vm7, %v725_v49 }
  0x12   : > { %s198_s24 = scalar_lea.vmem %s925_s0, %s496_s21  ;;  %271 = vst.msk [vmem:[#allocation4] sm:$0x1] (!%p499_p4), %vm268_vm7, %v725_v49  ;;  %272 = vst.msk [vmem:[#allocation5] sm:$0x1] (!%p499_p4), %vm268_vm7, %v725_v49 }
  0x13   : > { %v199_v0 = vld [vmem:[%s198_s24] sm:$0xff]  ;;  %274 = vst.msk [vmem:[#allocation6] sm:$0x1] (!%p499_p4), %vm273_vm8, %v725_v49 }
  0x14   : > { %v201_v1 = vsel %vm200_vm0, %v199_v0, -inf }
  0x15   : > { %202 = vmax.xlane.f32.xlu0 %v201_v1 }
  0xa2   : > { %v203_v2 = vpop.xlane.xlu0 %202 }
  0xa3   : > { %v204_v3 = vsub.f32 %v199_v0, %v203_v2 }
  0xa5   : > { %v205_v4 = vmul.f32 1.442695, %v204_v3 }
  0xa7   : > { %568 = vpow2.f32 %v205_v4 }
  0xb1   : > { %v569_v5 = vpop.eup %568 }
  0xb2   : > { %v207_v6 = vsel %vm200_vm0, %v569_v5, 0.0 }
  0xb3   : > { %208 = vadd.xlane.f32.xlu0 %v207_v6 }
 0x140   : > { %v209_v7 = vpop.xlane.xlu0 %208 }
 0x141   : > { %570 = vrcp.f32 %v209_v7 }
 0x142   : > { %572 = vlog2.f32 %v209_v7 }
 0x14b   : > { %v571_v8 = vpop.eup %570 }
 0x14c   : > { %v573_v9 = vpop.eup %572  ;;  %v780_v10 = vmul.f32 %v571_v8, %v569_v5 }
 0x14d   : > { %v258_v11 = vmul.f32 0.6931472, %v573_v9 }
 0x14e   : > { %v214_v12 = vsel %vm200_vm0, %v780_v10, -inf }
 0x14f   : > { %v784_v13 = vadd.f32 %v258_v11, %v203_v2  ;;  %215 = vmax.xlane.f32.xlu1 %v214_v12 }
 0x1dc   : > { %v216_v16 = vpop.xlane.xlu1 %215 }
 0x1dd   : > { %vm217_vm1 = vcmp.ge.f32.partialorder %v780_v10, %v216_v16 }
 0x1de   : > { %v218_v17 = vsel %vm217_vm1, %v213_v15, 8 }
 0x1df   : > { %v219_v18 = vsel %vm200_vm0, %v218_v17, 2147483647 }
 0x1e0   : > { %v221_v19 = vshra.s32 %v219_v18, 16  ;;  %v220_v21 = vand.u32 65535, %v219_v18 }
 0x1e2   : > { %v223_v20 = vcvt.s32.f32 %v221_v19  ;;  %v222_v23 = vcvt.s32.f32 %v220_v21 }
 0x1e4   : > { %224 = vmin.xlane.f32.xlu1 %v223_v20 }
 0x271   : > { %v225_v22 = vpop.xlane.xlu1 %224 }
 0x272   : > { %vm226_vm2 = vcmp.eq.f32.partialorder %v223_v20, %v225_v22  ;;  %v231_v25 = vcvt.f32.s32 %v225_v22 }
 0x273   : > { %v227_v24 = vsel %vm226_vm2, %v222_v23, inf }
 0x274   : > { %228 = vmin.xlane.f32.xlu0 %v227_v24  ;;  %v232_v27 = vshll.u32 %v231_v25, 16 }
 0x301   : > { %v229_v26 = vpop.xlane.xlu0 %228 }
 0x302   : > { %v230_v28 = vcvt.f32.s32 %v229_v26 }
 0x304   : > { %v233_v29 = vadd.s32 %v232_v27, %v230_v28 }
 0x306   : > { %vm234_vm3 = vcmp.eq.s32.totalorder %v213_v15, %v233_v29 }
 0x307   : > { %v235_v30 = vsel %vm234_vm3, -inf, %v780_v10  ;;  %v497_v32 = vsel %vm234_vm3, 1.0, %v724_v31 }
 0x308   : > { %v236_v33 = vsel %vm200_vm0, %v235_v30, -inf }
 0x309   : > { %237 = vmax.xlane.f32.xlu1 %v236_v33 }
 0x396   : > { %v238_v34 = vpop.xlane.xlu1 %237 }
 0x397   : > { %vm239_vm4 = vcmp.ge.f32.partialorder %v235_v30, %v238_v34 }
 0x398   : > { %v240_v35 = vsel %vm239_vm4, %v213_v15, 8 }
 0x399   : > { %v241_v36 = vsel %vm200_vm0, %v240_v35, 2147483647 }
 0x39a   : > { %v243_v37 = vshra.s32 %v241_v36, 16  ;;  %v242_v39 = vand.u32 65535, %v241_v36 }
 0x39c   : > { %v245_v38 = vcvt.s32.f32 %v243_v37  ;;  %v244_v41 = vcvt.s32.f32 %v242_v39 }
 0x39e   : > { %246 = vmin.xlane.f32.xlu0 %v245_v38 }
 0x42b   : > { %v247_v40 = vpop.xlane.xlu0 %246 }
 0x42c   : > { %vm248_vm5 = vcmp.eq.f32.partialorder %v245_v38, %v247_v40  ;;  %v253_v43 = vcvt.f32.s32 %v247_v40 }
 0x42d   : > { %v249_v42 = vsel %vm248_vm5, %v244_v41, inf }
 0x42e   : > { %250 = vmin.xlane.f32.xlu1 %v249_v42  ;;  %v254_v45 = vshll.u32 %v253_v43, 16 }
 0x4bb   : > { %v251_v44 = vpop.xlane.xlu1 %250  ;;  %267 = sbr.rel (%p499_p4) target bundleno = 1218 (0x4c2), region = 28 }
 0x4bc   : > { %v252_v46 = vcvt.f32.s32 %v251_v44 }
 0x4be   : > { %v255_v47 = vadd.s32 %v254_v45, %v252_v46 }
 0x4c0   : > { %vm256_vm6 = vcmp.eq.s32.totalorder %v213_v15, %v255_v47 }
 0x4c1   : > { %v498_v48 = vsel %vm256_vm6, 1.0, %v724_v31 }
 0x4c2 PF: > { %v275_v50 = vld [vmem:[#allocation2] sm:$0x1]  ;;  %vm277_vm9 = vcmask 57344   ;;  %v279_v51 = vld [vmem:[#allocation3] sm:$0x1]  ;;  %v303_v52 = vmax.f32 %v497_v32, %v498_v48  ;;  %v324_v53 = vmul.f32 %v784_v13, %v784_v13  ;;  %s515_s25 = scalar_lea.vmem [#allocation7], %s722_s18 }
 0x4c3   : > { %517 = vst.msk [vmem:[%s515_s25 - $0x1] sm:$0x1] %vm277_vm9, %v275_v50  ;;  %v283_v54 = vsel %vm200_vm0, %v497_v32, 0.0  ;;  %s518_s26 = scalar_lea.vmem [#allocation9], %s722_s18  ;;  %v293_v56 = vsel %vm200_vm0, %v498_v48, 0.0  ;;  %v314_v58 = vsel %vm200_vm0, %v780_v10, 0.0 }
 0x4c4   : > { %520 = vst.msk [vmem:[%s518_s26 - $0x1] sm:$0x1] %vm277_vm9, %v279_v51  ;;  %v284_v55 = vrot.slane %v283_v54, 4  ;;  %v304_v57 = vsel %vm200_vm0, %v303_v52, 0.0  ;;  %v294_v59 = vrot.slane %v293_v56, 4  ;;  %v315_v61 = vrot.slane %v314_v58, 4 }
 0x4c5   : > { %v305_v60 = vrot.slane %v304_v57, 4  ;;  %v325_v62 = vrot.slane %v324_v53, 4  ;;  %v282_v10 = vld [vmem:[#allocation2] sm:$0x1]  ;;  %v292_v16 = vld [vmem:[#allocation3] sm:$0x1] }
 0x4c6   : > { %v285_v63 = vadd.f32 %v284_v55, %v283_v54  ;;  %v295_v0 = vadd.f32 %v294_v59, %v293_v56  ;;  %v316_v2 = vadd.f32 %v315_v61, %v314_v58  ;;  %v302_v22 = vld [vmem:[#allocation4] sm:$0x1]  ;;  %v313_v23 = vld [vmem:[#allocation5] sm:$0x1]  ;;  %v323_v24 = vld [vmem:[#allocation6] sm:$0x1] }
 0x4c7   : > { %v306_v1 = vadd.f32 %v305_v60, %v304_v57  ;;  %v326_v3 = vadd.f32 %v325_v62, %v324_v53  ;;  %vm332_vm10 = vcmask 0   ;;  %p502_p5 = scmp.ne.s32.totalorder %s769_s19, 1 }
 0x4c8   : > { %v286_v4 = vrot.slane %v285_v63, 2  ;;  %v296_v5 = vrot.slane %v295_v0, 2  ;;  %v317_v7 = vrot.slane %v316_v2, 2 }
 0x4c9   : > { %v307_v6 = vrot.slane %v306_v1, 2  ;;  %v327_v8 = vrot.slane %v326_v3, 2 }
 0x4ca   : > { %v287_v9 = vadd.f32 %v286_v4, %v285_v63  ;;  %v297_v11 = vadd.f32 %v296_v5, %v295_v0  ;;  %v318_v13 = vadd.f32 %v317_v7, %v316_v2 }
 0x4cb   : > { %v308_v12 = vadd.f32 %v307_v6, %v306_v1  ;;  %v328_v14 = vadd.f32 %v327_v8, %v326_v3 }
 0x4cc   : > { %v288_v15 = vrot.slane %v287_v9, 1  ;;  %v298_v17 = vrot.slane %v297_v11, 1  ;;  %v319_v19 = vrot.slane %v318_v13, 1 }
 0x4cd   : > { %v309_v18 = vrot.slane %v308_v12, 1  ;;  %v329_v20 = vrot.slane %v328_v14, 1 }
 0x4ce   : > { %v289_v21 = vadd.f32 %v288_v15, %v287_v9  ;;  %v299_v25 = vadd.f32 %v298_v17, %v297_v11  ;;  %v320_v27 = vadd.f32 %v319_v19, %v318_v13  ;;  %337 = sbr.rel (%p502_p5) target bundleno = 1393 (0x571), region = 32 }
 0x4cf   : > { %v310_v26 = vadd.f32 %v309_v18, %v308_v12  ;;  %v330_v28 = vadd.f32 %v329_v20, %v328_v14 }
 0x4d0   : > { %v290_v29 = vadd.f32 %v289_v21, %v282_v10  ;;  %v300_v30 = vadd.f32 %v299_v25, %v292_v16  ;;  %v321_v32 = vadd.f32 %v320_v27, %v313_v23 }
 0x4d1   : > { %v311_v31 = vadd.f32 %v310_v26, %v302_v22  ;;  %v331_v33 = vadd.f32 %v330_v28, %v323_v24 }
 0x4d2   : > { %291 = vst.msk [vmem:[#allocation2] sm:$0x1] %vm277_vm9, %v290_v29  ;;  %301 = vst.msk [vmem:[#allocation3] sm:$0x1] %vm277_vm9, %v300_v30 }
 0x4d3   : > { %312 = vst.msk [vmem:[#allocation4] sm:$0x1] %vm277_vm9, %v311_v31  ;;  %322 = vst.msk [vmem:[#allocation5] sm:$0x1] %vm277_vm9, %v321_v32 }
 0x4d4   : > { %333 = vst.msk [vmem:[#allocation6] sm:$0x1] %vm332_vm10, %v331_v33 }
 0x4d9   : > { %v338_v34 = vld [vmem:[#allocation2] sm:$0x1] }
 0x4da   : > { %v340_v35 = vld [vmem:[#allocation4] sm:$0x1]  ;;  %v341_v36 = vld [vmem:[#allocation5] sm:$0x1]  ;;  %339 = vst.msk [vmem:[#allocation11] sm:$0x1] %vm277_vm9, %v338_v34 }
 0x4db   : > { %v342_v37 = vmul.f32 %v341_v36, %v340_v35  ;;  %v350_v39 = vld [vmem:[#allocation6] sm:$0x1] }
 0x4dc   : > { %v352_v40 = vmul.f32 0.0625, %v350_v39 }
 0x4dd   : > { %v343_v38 = vsel %vm277_vm9, %v342_v37, 0.0 }
 0x4de   : > { %344 = vadd.xlane.f32.xlu0 %v343_v38  ;;  %353 = vst.msk [vmem:[#allocation14] sm:$0x1] %vm332_vm10, %v352_v40 }
 0x56b   : > { %v345_v41 = vpop.xlane.xlu0 %344 }
 0x56c   : > { %v346_v42 = vmul.f32 8.0, %v345_v41 }
 0x56e   : > { %v348_v43 = vmul.f32 0.00390625, %v346_v42 }
 0x570   : > { %349 = vst.msk [vmem:[#allocation12] sm:$0x1] %vm332_vm10, %v348_v43 }
 0x571 PF: > { %p541_p6 = scmp.eq.s32.totalorder %s769_s19, 1  ;;  %s726_s27 = smov [#allocation9]  }
 0x572   : > { %s373_s28 = sshll.u32 %s726_s27, 4  ;;  %s727_s29 = smov [#allocation12]   ;;  %s374_s28 = int_to_ptr.vmem [resolvable:$true] %s373_s28 }
 0x573   : > { %s398_s30 = sshll.u32 %s727_s29, 4  ;;  %s574_s6 = scalar_lea.vmem %s374_s28, 32  ;;  %s399_s30 = int_to_ptr.vmem [resolvable:$true] %s398_s30 }
 0x574   : > { %p575_p7 = scmp.ne.s32.totalorder %s374_s28, %s574_s6  ;;  %p581_p10 = scmp.lt.s32.totalorder %s374_s28, %s374_s28 }
 0x575   : > { %p582_p11 = scmp.lt.s32.totalorder %s574_s6, %s574_s6 }
 0x576   : > { %p576_p8 = pnand %p575_p7, %p541_p6 }
 0x577   : > { %p583_p12 = por %p582_p11, %p581_p10 }
 0x578   : > { %p577_p9 = pneg %p576_p8 }
 0x57a   : > { %p584_p13 = pnand %p583_p12, %p577_p9 }
 0x57c   : > { %587 = shalt.err (!%p584_p13)
}
 0x57d   : > { %s588_s9 = scalar_lea.hbm %s927_s2, 32 }
 0x57e   : > { %p589_p0 = scmp.ne.s32.totalorder %s927_s2, %s588_s9  ;;  %p594_p3 = scmp.lt.u32.totalorder %s588_s9, %s927_s2 }
 0x580   : > { %p590_p1 = pnand %p589_p0, %p541_p6 }
 0x582   : > { %p591_p2 = pneg %p590_p1 }
 0x584   : > { %p596_p4 = pnand %p594_p3, %p591_p2 }
 0x586   : > { %599 = shalt.err (!%p596_p4)
}
 0x587   : > { %s728_s14 = smov 16   ;;  %s729_s15 = smov 1  }
 0x588   : > { %524 = dma.vmem_to_hbm [thread:$0]  (%p541_p6), %s374_s28, 32, %s927_s2, [#allocation10], %s728_s14, %s728_s14, %s729_s15  }
 0x589   : > { %s600_s20 = scalar_lea.vmem %s399_s30, 16  ;;  %s606_s21 = scalar_lea.vmem %s399_s30, 32 }
 0x58a   : > { %p601_p5 = scmp.ne.s32.totalorder %s399_s30, %s600_s20  ;;  %p607_p9 = scmp.lt.s32.totalorder %s399_s30, %s399_s30 }
 0x58b   : > { %p608_p10 = scmp.lt.s32.totalorder %s606_s21, %s600_s20 }
 0x58c   : > { %p602_p7 = pnand %p601_p5, %p541_p6 }
 0x58d   : > { %p609_p11 = por %p608_p10, %p607_p9 }
 0x58e   : > { %p603_p8 = pneg %p602_p7 }
 0x590   : > { %p610_p12 = pnand %p609_p11, %p603_p8 }
 0x592   : > { %613 = shalt.err (!%p610_p12)
}
 0x593   : > { %s614_s24 = scalar_lea.hbm %s929_s4, 16 }
 0x594   : > { %p615_p13 = scmp.ne.s32.totalorder %s929_s4, %s614_s24  ;;  %p620_p2 = scmp.lt.u32.totalorder %s614_s24, %s929_s4 }
 0x596   : > { %p616_p0 = pnand %p615_p13, %p541_p6 }
 0x598   : > { %p617_p1 = pneg %p616_p0 }
 0x59a   : > { %p622_p3 = pnand %p620_p2, %p617_p1 }
 0x59c   : > { %625 = shalt.err (!%p622_p3)
}
 0x59d   : > { %528 = dma.vmem_to_hbm [thread:$0]  (%p541_p6), %s399_s30, 16, %s929_s4, [#allocation13]  }
 0x59e   : > { %s730_s7 = smov [#allocation7]   ;;  %s731_s9 = smov [#allocation11]  }
 0x59f   : > { %s360_s8 = sshll.u32 %s730_s7, 4  ;;  %s387_s10 = sshll.u32 %s731_s9, 4  ;;  %s361_s8 = int_to_ptr.vmem [resolvable:$true] %s360_s8  ;;  %s388_s10 = int_to_ptr.vmem [resolvable:$true] %s387_s10 }
 0x5a0   : > { %s626_s11 = scalar_lea.vmem %s361_s8, 32  ;;  %p633_p8 = scmp.lt.s32.totalorder %s361_s8, %s361_s8 }
 0x5a1   : > { %p627_p4 = scmp.ne.s32.totalorder %s361_s8, %s626_s11  ;;  %p634_p9 = scmp.lt.s32.totalorder %s626_s11, %s626_s11 }
 0x5a3   : > { %p628_p5 = pnand %p627_p4, %p541_p6  ;;  %p635_p10 = por %p634_p9, %p633_p8 }
 0x5a5   : > { %p629_p7 = pneg %p628_p5 }
 0x5a7   : > { %p636_p11 = pnand %p635_p10, %p629_p7 }
 0x5a9   : > { %639 = shalt.err (!%p636_p11)
}
 0x5aa   : > { %s640_s30 = scalar_lea.hbm %s926_s1, 32 }
 0x5ab   : > { %p641_p12 = scmp.ne.s32.totalorder %s926_s1, %s640_s30  ;;  %p646_p1 = scmp.lt.u32.totalorder %s640_s30, %s926_s1 }
 0x5ad   : > { %p642_p13 = pnand %p641_p12, %p541_p6 }
 0x5af   : > { %p643_p0 = pneg %p642_p13 }
 0x5b1   : > { %p648_p2 = pnand %p646_p1, %p643_p0 }
 0x5b3   : > { %651 = shalt.err (!%p648_p2)
}
 0x5b4   : > { %522 = dma.vmem_to_hbm [thread:$0]  (%p541_p6), %s361_s8, 32, %s926_s1, [#allocation8], %s728_s14, %s728_s14, %s729_s15  }
 0x5b5   : > { %s652_s24 = scalar_lea.vmem %s388_s10, 16  ;;  %s658_s25 = scalar_lea.vmem %s388_s10, 32 }
 0x5b6   : > { %p653_p3 = scmp.ne.s32.totalorder %s388_s10, %s652_s24  ;;  %p659_p7 = scmp.lt.s32.totalorder %s388_s10, %s388_s10 }
 0x5b7   : > { %p660_p8 = scmp.lt.s32.totalorder %s658_s25, %s652_s24 }
 0x5b8   : > { %p654_p4 = pnand %p653_p3, %p541_p6 }
 0x5b9   : > { %p661_p9 = por %p660_p8, %p659_p7 }
 0x5ba   : > { %p655_p5 = pneg %p654_p4 }
 0x5bc   : > { %p662_p10 = pnand %p661_p9, %p655_p5 }
 0x5be   : > { %665 = shalt.err (!%p662_p10)
}
 0x5bf   : > { %s666_s28 = scalar_lea.hbm %s928_s3, 16 }
 0x5c0   : > { %p667_p11 = scmp.ne.s32.totalorder %s928_s3, %s666_s28  ;;  %p672_p0 = scmp.lt.u32.totalorder %s666_s28, %s928_s3 }
 0x5c2   : > { %p668_p12 = pnand %p667_p11, %p541_p6 }
 0x5c4   : > { %p669_p13 = pneg %p668_p12 }
 0x5c6   : > { %p674_p1 = pnand %p672_p0, %p669_p13 }
 0x5c8   : > { %677 = shalt.err (!%p674_p1)
}
 0x5c9   : > { %526 = dma.vmem_to_hbm [thread:$0]  (%p541_p6), %s388_s10, 16, %s928_s3, [#allocation10]  }
 0x5ca   : > { %s732_s9 = smov [#allocation14]  }
 0x5cb   : > { %s409_s11 = sshll.u32 %s732_s9, 4  ;;  %s410_s11 = int_to_ptr.vmem [resolvable:$true] %s409_s11 }
 0x5cc   : > { %s678_s12 = scalar_lea.vmem %s410_s11, 16  ;;  %s684_s13 = scalar_lea.vmem %s410_s11, 32 }
 0x5cd   : > { %p679_p2 = scmp.ne.s32.totalorder %s410_s11, %s678_s12  ;;  %p685_p5 = scmp.lt.s32.totalorder %s410_s11, %s410_s11 }
 0x5ce   : > { %p686_p7 = scmp.lt.s32.totalorder %s684_s13, %s678_s12 }
 0x5cf   : > { %p680_p3 = pnand %p679_p2, %p541_p6 }
 0x5d0   : > { %p687_p8 = por %p686_p7, %p685_p5 }
 0x5d1   : > { %p681_p4 = pneg %p680_p3 }
 0x5d3   : > { %p688_p9 = pnand %p687_p8, %p681_p4 }
 0x5d5   : > { %691 = shalt.err (!%p688_p9)
}
 0x5d6   : > { %s692_s17 = scalar_lea.hbm %s930_s5, 16 }
 0x5d7   : > { %p693_p10 = scmp.ne.s32.totalorder %s930_s5, %s692_s17  ;;  %p698_p13 = scmp.lt.u32.totalorder %s692_s17, %s930_s5 }
 0x5d9   : > { %p694_p11 = pnand %p693_p10, %p541_p6 }
 0x5db   : > { %p695_p12 = pneg %p694_p11 }
 0x5dd   : > { %p700_p0 = pnand %p698_p13, %p695_p12 }
 0x5df   : > { %703 = shalt.err (!%p700_p0)
}
 0x5e0   : > { %530 = dma.vmem_to_hbm [thread:$0]  (%p541_p6), %s410_s11, 16, %s930_s5, [#allocation13]  }
 0x5e1   : > { %709 = dma.done.wait (%p541_p6), [#allocation8], 32  }
 0x5e2   : > { %711 = vsyncadd (%p541_p6), [#allocation8], 4294967264 }
 0x5e3   : > { %713 = dma.done.wait (%p541_p6), [#allocation10], 48  }
 0x5e4   : > { %715 = vsyncadd (%p541_p6), [#allocation10], 4294967248 }
 0x5e5   : > { %717 = dma.done.wait (%p541_p6), [#allocation13], 32  }
 0x5e6   : > { %719 = vsyncadd (%p541_p6), [#allocation13], 4294967264 }
 0x5e7 PF: > { %s19_s18 = sadd.s32 1, %s722_s18  }
 0x5e8   : > { %p16_p1 = scmp.ge.s32.totalorder %s19_s18, 4  }
 0x5ea   :  { %18 = sbr.rel (!%p16_p1) target bundleno = 3 (0x3), region = 93 }
 0x5f1   :  { %438 = vsyncpa [#allocation8], 1 }
 0x5f2   :  { %440 = vsyncpa [#allocation8 + $0x1], 1 }
 0x5f3   :  { %441 = vsyncpa [#allocation10], 1 }
 0x5f4   :  { %442 = vsyncpa [#allocation13], 1 }

</bundles_post_ra>
